<compile_context>
chip_gen: v7x
topology: tpu7x:2x2x1
jax: 0.10.0
libtpu: 0.0.40
codegen_flags: <defaults>
</compile_context>

<pallas_src>
import jax
import jax.numpy as jnp
from jax.experimental import pallas as pl
from jax.experimental.pallas import tpu as pltpu


# ----------------------------------------------------------------------------
# Kernel: one MXU matmul + f32 bias/ReLU epilogue, fully lane-dense.
# ----------------------------------------------------------------------------
def side_block_kernel(p_ref, w_ref, b_ref, relu_ref, raw_ref):
    # p_ref   : (tm, W*9*Cin)     bf16 row-wise im2col patches (lane-dense rows)
    # w_ref   : (W*9*Cin, W*Cout) bf16 block-diagonal conv weights (static)
    # b_ref   : (1, W*Cout)       f32 bias tiled along W
    # relu_ref: (tm, W*Cout)      relu(conv(x)), lane-dense (last dim = 128)
    # raw_ref : (tm, W*Cout)      conv(x) pre-activation, lane-dense
    acc = jnp.dot(p_ref[...], w_ref[...], preferred_element_type=jnp.float32)
    acc = acc + b_ref[...]                      # f32 bias add on VPU
    raw_ref[...] = acc.astype(raw_ref.dtype)
    relu_ref[...] = jnp.maximum(acc, 0.0).astype(relu_ref.dtype)


# ----------------------------------------------------------------------------
# One-time parameter preparation (hoisted out of the per-call forward).
# ----------------------------------------------------------------------------
_PATCH_DN = ("NCHW", "OIHW", "NHWC")   # must match the forward's patches call


def _patch_feature_order(cin, ksize):
    """Probe (once, concretely) the feature ordering of conv_general_dilated_patches.

    Returns perm[j] = ci*ksize*ksize + ky*ksize + kx for output feature j, so the
    weight matrix can be laid out to match the patches op exactly, regardless of
    its internal channel/tap ordering convention.
    """
    probe = jnp.arange(cin * ksize * ksize, dtype=jnp.float32).reshape(
        1, cin, ksize, ksize)
    pat = jax.lax.conv_general_dilated_patches(
        probe, (ksize, ksize), (1, 1), padding="VALID",
        dimension_numbers=_PATCH_DN)            # (1, 1, 1, ksize*ksize*cin)
    return pat.reshape(-1).astype(jnp.int32)    # exact small integers


def prepare_side_block_params(w_oihw, bias, W, *, operand_dtype=jnp.bfloat16):
    """Build the block-diagonal weight + tiled bias once (module-init time)."""
    cout, cin, kh, kw = w_oihw.shape
    assert (kh, kw) == (3, 3), "SideBlock kernel assumes a 3x3 conv"
    K = kh * kw * cin

    # Weight rows in canonical (ci, ky, kx) order, then permuted to match the
    # patches op's feature-dim ordering (probed above).
    perm = _patch_feature_order(cin, 3)
    w_ckk = jnp.transpose(w_oihw, (1, 2, 3, 0)).reshape(K, cout)   # row = ci*9+ky*3+kx
    w_mat = w_ckk[perm]                                            # (K, Cout)

    # Block-diagonal expansion over the W output positions: a single matmul then
    # emits the output directly in lane-dense (row, W*Cout) layout.
    eye_w = jnp.eye(W, dtype=w_mat.dtype)
    w_blk = jnp.einsum("uv,kc->ukvc", eye_w, w_mat).reshape(W * K, W * cout)
    w_blk = w_blk.astype(operand_dtype)

    b_tiled = jnp.tile(bias.astype(jnp.float32), W).reshape(1, W * cout)
    return w_blk, b_tiled


# ----------------------------------------------------------------------------
# Jitted forward: 1 patches op + 1 pallas_call + output layout plumbing.
# ----------------------------------------------------------------------------
@jax.jit
def side_block_forward(x_nchw, w_blk, b_tiled):
    """SideBlock.forward: returns (relu(conv(x)), conv(x)) in NCHW."""
    B, Cin, H, W = x_nchw.shape
    WCout = b_tiled.shape[1]
    Cout = WCout // W
    K = 9 * Cin
    operand_dtype = w_blk.dtype

    # Single fused op replacing transpose+pad+9-slice-concat: row-wise im2col
    # patches emitted directly as (B, H, W, 9*Cin), NCHW input.
    patches = jax.lax.conv_general_dilated_patches(
        x_nchw, (3, 3), (1, 1), padding=((1, 1), (1, 1)),
        dimension_numbers=_PATCH_DN)
    patches = patches.reshape(B * H, W * K).astype(operand_dtype)

    rows = B * H
    # Row tiling, size-gated: single invocation at toy sizes (per-step overhead
    # would dominate); tile + megacore-parallel leading axis once rows grow.
    if rows >= 512 and rows % 256 == 0:
        tm = 256
    else:
        tm = rows
    grid = (rows // tm,)

    out_shape = (
        jax.ShapeDtypeStruct((rows, WCout), x_nchw.dtype),
        jax.ShapeDtypeStruct((rows, WCout), x_nchw.dtype),
    )

    relu_flat, raw_flat = pl.pallas_call(
        side_block_kernel,
        out_shape=out_shape,
        grid=grid,
        in_specs=[
            pl.BlockSpec((tm, W * K), lambda i: (i, 0)),      # patches (row-tiled)
            pl.BlockSpec((W * K, WCout), lambda i: (0, 0)),   # block-diag weight
            pl.BlockSpec((1, WCout), lambda i: (0, 0)),       # tiled bias
        ],
        out_specs=(
            pl.BlockSpec((tm, WCout), lambda i: (i, 0)),
            pl.BlockSpec((tm, WCout), lambda i: (i, 0)),
        ),
        compiler_params=pltpu.CompilerParams(
            dimension_semantics=("parallel",)),               # v7x 2nd TensorCore
    )(patches, w_blk, b_tiled)

    # NCHW output contract of the PyTorch module (would vanish in an NHWC model).
    relu_out = jnp.transpose(relu_flat.reshape(B, H, W, Cout), (0, 3, 1, 2))
    raw_out = jnp.transpose(raw_flat.reshape(B, H, W, Cout), (0, 3, 1, 2))
    return relu_out, raw_out


# ----------------------------------------------------------------------------
# Reference + test
# ----------------------------------------------------------------------------
def _reference(x_nchw, w_oihw, bias, operand_dtype=jnp.float32):
    raw = jax.lax.conv_general_dilated(
        x_nchw.astype(operand_dtype), w_oihw.astype(operand_dtype),
        window_strides=(1, 1), padding=((1, 1), (1, 1)),
        dimension_numbers=("NCHW", "OIHW", "NCHW"),
        preferred_element_type=jnp.float32)
    raw = raw + bias.astype(jnp.float32)[None, :, None, None]
    return jnp.maximum(raw, 0.0), raw


if __name__ == "__main__":
    # Small shapes consistent with the module: batch=2, in_c=4, out_c=8, 16x16.
    B, Cin, Cout, H, W = 2, 4, 8, 16, 16
    key = jax.random.PRNGKey(0)
    kx_, kw_, kb_ = jax.random.split(key, 3)

    x = jax.random.normal(kx_, (B, Cin, H, W), dtype=jnp.float32)
    # Deterministic conv params (synthetic, not a checkpoint load).
    fan_in = Cin * 3 * 3
    w = jax.random.normal(kw_, (Cout, Cin, 3, 3), dtype=jnp.float32) / jnp.sqrt(fan_in)
    b = jax.random.normal(kb_, (Cout,), dtype=jnp.float32) * 0.1

    # Module-init-time prep (hoisted out of the per-call forward).
    w_blk, b_tiled = prepare_side_block_params(w, b, W, operand_dtype=jnp.bfloat16)

    relu_out, raw_out = side_block_forward(x, w_blk, b_tiled)
    relu_out = jax.block_until_ready(relu_out)
    raw_out = jax.block_until_ready(raw_out)

    # Primary check: bf16-operand-consistent reference (f32 accumulation), tight tol.
    ref_relu, ref_raw = _reference(x, w, b, operand_dtype=jnp.bfloat16)
    assert jnp.allclose(raw_out, ref_raw, atol=1e-3, rtol=1e-3)
    assert jnp.allclose(relu_out, ref_relu, atol=1e-3, rtol=1e-3)

    # Sanity check vs full-f32 reference: only bf16 operand-rounding error remains.
    ref_relu32, ref_raw32 = _reference(x, w, b, operand_dtype=jnp.float32)
    assert jnp.allclose(raw_out, ref_raw32, atol=5e-2, rtol=5e-2)
    assert jnp.allclose(relu_out, ref_relu32, atol=5e-2, rtol=5e-2)

    print("KERNEL_OK")
</pallas_src>

<mosaic_0001>
module attributes {stable_mosaic.version = 11 : i64} {
  func.func @side_block_kernel(%arg0: i32, %arg1: memref<32x576xbf16, #tpu.memory_space<vmem>>, %arg2: memref<576x128xbf16, #tpu.memory_space<vmem>>, %arg3: memref<1x128xf32, #tpu.memory_space<vmem>>, %arg4: memref<32x128xf32, #tpu.memory_space<vmem>>, %arg5: memref<32x128xf32, #tpu.memory_space<vmem>>) attributes {dimension_semantics = [#tpu.dimension_semantics<parallel>], iteration_bounds = array<i64: 1>, scalar_prefetch = 0 : i64, scratch_operands = 0 : i64, tpu.core_type = #tpu.core_type<tc>, window_params = [{transform_indices = @transform_0, window_bounds = array<i64: 32, 576>}, {pipeline_mode = #tpu.pipeline_mode<synchronous>, transform_indices = @transform_1, window_bounds = array<i64: 576, 128>}, {pipeline_mode = #tpu.pipeline_mode<synchronous>, transform_indices = @transform_2, window_bounds = array<i64: 1, 128>}, {transform_indices = @transform_3, window_bounds = array<i64: 32, 128>}, {transform_indices = @transform_4, window_bounds = array<i64: 32, 128>}]} {
    %c0 = arith.constant 0 : index
    %c0_0 = arith.constant 0 : index
    %0 = vector.load %arg1[%c0, %c0_0] : memref<32x576xbf16, #tpu.memory_space<vmem>>, vector<32x576xbf16>
    %c0_1 = arith.constant 0 : index
    %c0_2 = arith.constant 0 : index
    %1 = vector.load %arg2[%c0_1, %c0_2] : memref<576x128xbf16, #tpu.memory_space<vmem>>, vector<576x128xbf16>
    %cst = arith.constant dense<0.000000e+00> : vector<32x128xf32>
    %2 = tpu.matmul %0, %1, %cst {dimension_numbers = #tpu.dot_dimension_numbers<[1], [0], [0], [1], [0, 0, 1, 1], [], []>} : vector<32x576xbf16>, vector<576x128xbf16>, vector<32x128xf32> -> vector<32x128xf32>
    %c0_3 = arith.constant 0 : index
    %c0_4 = arith.constant 0 : index
    %3 = vector.load %arg3[%c0_3, %c0_4] : memref<1x128xf32, #tpu.memory_space<vmem>>, vector<1x128xf32>
    %4 = vector.broadcast %3 : vector<1x128xf32> to vector<32x128xf32>
    %5 = arith.addf %2, %4 : vector<32x128xf32>
    %c0_5 = arith.constant 0 : index
    %c0_6 = arith.constant 0 : index
    %6 = vector.load %arg5[%c0_5, %c0_6] : memref<32x128xf32, #tpu.memory_space<vmem>>, vector<32x128xf32>
    tpu.vector_store %arg5[%c0_5, %c0_6], %5 {strides = array<i32>} : memref<32x128xf32, #tpu.memory_space<vmem>>, vector<32x128xf32>,
    %cst_7 = arith.constant 0.000000e+00 : f32
    %7 = vector.broadcast %cst_7 : f32 to vector<32x128xf32>
    %8 = arith.maximumf %5, %7 : vector<32x128xf32>
    %c0_8 = arith.constant 0 : index
    %c0_9 = arith.constant 0 : index
    %9 = vector.load %arg4[%c0_8, %c0_9] : memref<32x128xf32, #tpu.memory_space<vmem>>, vector<32x128xf32>
    tpu.vector_store %arg4[%c0_8, %c0_9], %8 {strides = array<i32>} : memref<32x128xf32, #tpu.memory_space<vmem>>, vector<32x128xf32>,
    return
  }
  func.func @transform_0(%arg0: i32) -> (i32, i32) {
    %c0_i32 = arith.constant 0 : i32
    %c0_i32_0 = arith.constant 0 : i32
    return %arg0, %c0_i32 : i32, i32
  }
  func.func @transform_1(%arg0: i32) -> (i32, i32) {
    %c0_i32 = arith.constant 0 : i32
    %c0_i32_0 = arith.constant 0 : i32
    %c0_i32_1 = arith.constant 0 : i32
    return %c0_i32, %c0_i32_0 : i32, i32
  }
  func.func @transform_2(%arg0: i32) -> (i32, i32) {
    %c0_i32 = arith.constant 0 : i32
    %c0_i32_0 = arith.constant 0 : i32
    %c0_i32_1 = arith.constant 0 : i32
    return %c0_i32, %c0_i32_0 : i32, i32
  }
  func.func @transform_3(%arg0: i32) -> (i32, i32) {
    %c0_i32 = arith.constant 0 : i32
    %c0_i32_0 = arith.constant 0 : i32
    return %arg0, %c0_i32 : i32, i32
  }
  func.func @transform_4(%arg0: i32) -> (i32, i32) {
    %c0_i32 = arith.constant 0 : i32
    %c0_i32_0 = arith.constant 0 : i32
    return %arg0, %c0_i32 : i32, i32
  }
}

</mosaic_0001>

<bundles_post_ra>
// kernel: side_block_forward.1
= control target key start
LH: loop header
LB: loop body
LE: loop exit
PB: predicated region body
PF: predicated region fallthrough
CT: control target
= control target key end

     0   :  { %vm374_vm0 = vcmask 523264   ;;  %s911_s1 = inlined_call_operand.vmem [shape: bf16[576,128], index: 1, kind: input, shape index: {}]   ;;  %s912_s0 = inlined_call_operand.vmem [shape: bf16[32,576], index: 0, kind: input, shape index: {}]   ;;  %s913_s2 = inlined_call_operand.vmem [shape: f32[1,128], index: 2, kind: input, shape index: {}]   ;;  %s914_s4 = inlined_call_operand.vmem [shape: f32[32,128], index: 4, kind: output, shape index: {1}]   ;;  %s915_s3 = inlined_call_operand.vmem [shape: f32[32,128], index: 3, kind: output, shape index: {0}]  }
   0x1   :  { %v671_v0 = vld [vmem:[%s911_s1 + $0x40] sm:$0xff]   ;;  %v675_v4 = vld [vmem:[%s911_s1 + $0x48] sm:$0xff]   ;;  %v679_v8 = vld [vmem:[%s911_s1 + $0x50] sm:$0xff]  }
   0x2   :  { %v672_v1 = vld [vmem:[%s911_s1] sm:$0xff]   ;;  %597 = vmatprep.subr.bf16.mxu0 %v671_v0  ;;  %v676_v5 = vld [vmem:[%s911_s1 + $0x8] sm:$0xff]   ;;  %v680_v9 = vld [vmem:[%s911_s1 + $0x10] sm:$0xff]  }
   0x3   :  { %v673_v2 = vld [vmem:[%s911_s1 + $0xc0] sm:$0xff]   ;;  %598 = vmatpush3.bf16.msra.mxu0 %v672_v1  ;;  %v677_v6 = vld [vmem:[%s911_s1 + $0xc8] sm:$0xff]   ;;  %v681_v10 = vld [vmem:[%s911_s1 + $0xd0] sm:$0xff]  }
   0x4   :  { %v674_v3 = vld [vmem:[%s911_s1 + $0x80] sm:$0xff]   ;;  %625 = vmatprep.subr.bf16.mxu1 %v673_v2  ;;  %599 = vmatprep.subr.bf16.mxu0 %v675_v4  ;;  %v678_v7 = vld [vmem:[%s911_s1 + $0x88] sm:$0xff]   ;;  %v682_v11 = vld [vmem:[%s911_s1 + $0x90] sm:$0xff]  }
   0x5   :  { %626 = vmatpush3.bf16.msra.mxu1 %v674_v3  ;;  %v683_v12 = vld [vmem:[%s911_s1 + $0x58] sm:$0xff]   ;;  %v687_v16 = vld [vmem:[%s911_s1 + $0x60] sm:$0xff]   ;;  %v691_v20 = vld [vmem:[%s911_s1 + $0x68] sm:$0xff]  }
   0x6   :  { %627 = vmatprep.subr.bf16.mxu1 %v677_v6  ;;  %v684_v13 = vld [vmem:[%s911_s1 + $0x18] sm:$0xff]   ;;  %v688_v17 = vld [vmem:[%s911_s1 + $0x20] sm:$0xff]   ;;  %v692_v21 = vld [vmem:[%s911_s1 + $0x28] sm:$0xff]  }
   0x7   :  { %600 = vmatpush3.bf16.msra.mxu0 %v676_v5  ;;  %v685_v14 = vld [vmem:[%s911_s1 + $0xd8] sm:$0xff]   ;;  %v689_v18 = vld [vmem:[%s911_s1 + $0xe0] sm:$0xff]   ;;  %v693_v22 = vld [vmem:[%s911_s1 + $0xe8] sm:$0xff]  }
   0x8   :  { %601 = vmatprep.subr.bf16.mxu0 %v679_v8  ;;  %v686_v15 = vld [vmem:[%s911_s1 + $0x98] sm:$0xff]   ;;  %v690_v19 = vld [vmem:[%s911_s1 + $0xa0] sm:$0xff]   ;;  %v694_v23 = vld [vmem:[%s911_s1 + $0xa8] sm:$0xff]  }
   0x9   :  { %628 = vmatpush3.bf16.msra.mxu1 %v678_v7  ;;  %v695_v24 = vld [vmem:[%s911_s1 + $0x70] sm:$0xff]   ;;  %v699_v28 = vld [vmem:[%s911_s1 + $0x78] sm:$0xff]   ;;  %v706_v34 = vld [vmem:[%s911_s1 + $0x100] sm:$0xff]  }
   0xa   :  { %629 = vmatprep.subr.bf16.mxu1 %v681_v10  ;;  %v696_v25 = vld [vmem:[%s911_s1 + $0x30] sm:$0xff]   ;;  %v700_v29 = vld [vmem:[%s911_s1 + $0x38] sm:$0xff]   ;;  %v709_v36 = vld [vmem:[%s912_s0 + $0xc] ss:$20 sps:$4 sm:$0xff]  }
   0xb   :  { %602 = vmatpush3.bf16.msra.mxu0 %v680_v9  ;;  %v697_v26 = vld [vmem:[%s911_s1 + $0xf0] sm:$0xff]   ;;  %v701_v30 = vld [vmem:[%s911_s1 + $0xf8] sm:$0xff]   ;;  %v710_v37 = vld [vmem:[%s911_s1 + $0x108] sm:$0xff]   ;;  %462 = vmatprep.mubr.bf16.mxu1 %v709_v36 }
   0xc   :  { %603 = vmatprep.subr.bf16.mxu0 %v683_v12  ;;  %v698_v27 = vld [vmem:[%s911_s1 + $0xb0] sm:$0xff]   ;;  %v704_v32 = vld [vmem:[%s912_s0 + $0x4] ss:$20 sps:$4 sm:$0xff]   ;;  %v707_v35 = vld [vmem:[%s912_s0 + $0x8] ss:$20 sps:$4 sm:$0xff]  }
   0xd   :  { %630 = vmatpush3.bf16.msra.mxu1 %v682_v11  ;;  %v702_v31 = vld [vmem:[%s912_s0] ss:$20 sps:$4 sm:$0xff]   ;;  %v705_v33 = vld [vmem:[%s911_s1 + $0xb8] sm:$0xff]   ;;  %413 = vmatprep.mubr.bf16.mxu0 %v704_v32  ;;  %v717_v42 = vld [vmem:[%s912_s0 + $0x30] ss:$20 sps:$4 sm:$0xff]  }
   0xe   :  { %631 = vmatprep.subr.bf16.mxu1 %v685_v14  ;;  %v711_v38 = vld [vmem:[%s912_s0 + $0x2c] ss:$20 sps:$4 sm:$0xff]   ;;  %v713_v39 = vld [vmem:[%s912_s0 + $0x28] ss:$20 sps:$4 sm:$0xff]   ;;  %v714_v40 = vld [vmem:[%s911_s1 + $0x110] sm:$0xff]  }
   0xf   :  { %604 = vmatpush3.bf16.msra.mxu0 %v684_v13  ;;  %v715_v41 = vld [vmem:[%s912_s0 + $0x34] ss:$20 sps:$4 sm:$0xff]   ;;  %v718_v43 = vld [vmem:[%s911_s1 + $0x118] sm:$0xff]   ;;  %v719_v44 = vld [vmem:[%s912_s0 + $0x10] ss:$20 sps:$4 sm:$0xff]  }
  0x10   :  { %605 = vmatprep.subr.bf16.mxu0 %v687_v16  ;;  %v720_v45 = vld [vmem:[%s912_s0 + $0x38] ss:$20 sps:$4 sm:$0xff]   ;;  %v548_v47 = vld [vmem:[%s913_s2] ss:$0 sm:$0xff] }
  0x11   :  { %632 = vmatpush3.bf16.msra.mxu1 %v686_v15 }
  0x12   :  { %633 = vmatprep.subr.bf16.mxu1 %v689_v18 }
  0x13   :  { %606 = vmatpush3.bf16.msra.mxu0 %v688_v17 }
  0x14   :  { %607 = vmatprep.subr.bf16.mxu0 %v691_v20 }
  0x15   :  { %634 = vmatpush3.bf16.msra.mxu1 %v690_v19 }
  0x16   :  { %635 = vmatprep.subr.bf16.mxu1 %v693_v22 }
  0x17   :  { %608 = vmatpush3.bf16.msra.mxu0 %v692_v21 }
  0x18   :  { %609 = vmatprep.subr.bf16.mxu0 %v695_v24 }
  0x19   :  { %636 = vmatpush3.bf16.msra.mxu1 %v694_v23 }
  0x1a   :  { %637 = vmatprep.subr.bf16.mxu1 %v697_v26 }
  0x1b   :  { %610 = vmatpush3.bf16.msra.mxu0 %v696_v25 }
  0x1c   :  { %611 = vmatprep.subr.bf16.mxu0 %v699_v28 }
  0x1d   :  { %638 = vmatpush3.bf16.msra.mxu1 %v698_v27 }
  0x1e   :  { %639 = vmatprep.subr.bf16.mxu1 %v701_v30 }
  0x1f   :  { %612 = vmatpush3.bf16.msra.mxu0 %v700_v29 }
  0x20   :  { %659 = vmatprep.subr.bf16.mxu0 %v706_v34 }
  0x21   :  { %640 = vmatpush3.bf16.msra.mxu1 %v705_v33 }
  0x22   :  { %414 = vmatmul.mubr.bf16.vlgmr.msra.gmra.mrb[0].mxu0 %v702_v31 }
  0x23   :  { %660 = vmatpush3.bf16.msra.mxu0 %v706_v34  ;;  %421 = vmatprep.mubr.bf16.mxu0 %v711_v38 }
  0x24   :  { %463 = vmatmul.mubr.bf16.vlgmr.msra.gmra.mrb[0].mxu1 %v707_v35  ;;  %661 = vmatprep.subr.bf16.mxu0 %v710_v37 }
  0x25   :  { %470 = vmatprep.mubr.bf16.mxu1 %v715_v41 }
  0x27   :  { %662 = vmatpush3.bf16.msra.mxu0 %v710_v37 }
  0x28   :  { %663 = vmatprep.subr.bf16.mxu0 %v714_v40 }
  0x2a   :  { %422 = vmatmul.mubr.bf16.gmra.mrb[4].mxu0 %v713_v39 }
  0x2b   :  { %667 = vmatprep.mubr.msk.bf16.mxu0 %vm374_vm0, %v719_v44  ;;  %664 = vmatpush3.bf16.msra.mxu0 %v714_v40 }
  0x2c   :  { %471 = vmatmul.mubr.bf16.gmra.mrb[4].mxu1 %v717_v42  ;;  %665 = vmatprep.subr.bf16.mxu0 %v718_v43 }
  0x2f   :  { %666 = vmatpush3.bf16.msra.mxu0 %v718_v43 }
  0x32   :  { %668 = vmatmul.mubr.msk.bf16.vlgmr.msra.gmra.mrb[8].mxu0 %vm374_vm0, %v720_v45 }
  0xf5   :  { %v613_v46 = vpop.f32.mrb[0].mxu0 }
  0xf6   :  { %v614_v48 = vpop.f32.mrb[1].mxu0 }
  0xf7   :  { %v615_v49 = vadd.f32 %v614_v48, %v613_v46  ;;  %v616_v50 = vpop.f32.mrb[2].mxu0  ;;  %v641_v51 = vpop.f32.mrb[0].mxu1 }
  0xf8   :  { %v617_v52 = vpop.f32.mrb[3].mxu0  ;;  %v642_v55 = vpop.f32.mrb[1].mxu1 }
  0xf9   :  { %v416_v53 = vadd.f32 %v615_v49, %v548_v47  ;;  %v618_v54 = vadd.f32 %v617_v52, %v616_v50  ;;  %v643_v56 = vadd.f32 %v642_v55, %v641_v51  ;;  %v644_v57 = vpop.f32.mrb[2].mxu1 }
  0xfa   :  { %v645_v59 = vpop.f32.mrb[3].mxu1 }
  0xfb   :  { %v419_v58 = vadd.f32 %v618_v54, %v548_v47  ;;  %v646_v60 = vadd.f32 %v645_v59, %v644_v57  ;;  %v465_v61 = vadd.f32 %v643_v56, %v416_v53 }
  0xfd   :  { %v619_v62 = vpop.f32.mrb[4].mxu0  ;;  %v468_v0 = vadd.f32 %v646_v60, %v419_v58 }
  0xfe   :  { %v620_v63 = vpop.f32.mrb[5].mxu0 }
  0xff   :  { %v621_v1 = vadd.f32 %v620_v63, %v619_v62  ;;  %v622_v2 = vpop.f32.mrb[6].mxu0  ;;  %v647_v3 = vpop.f32.mrb[4].mxu1 }
 0x100   :  { %v623_v4 = vpop.f32.mrb[7].mxu0  ;;  %v648_v7 = vpop.f32.mrb[5].mxu1 }
 0x101   :  { %v424_v5 = vadd.f32 %v621_v1, %v548_v47  ;;  %v624_v6 = vadd.f32 %v623_v4, %v622_v2  ;;  %v649_v8 = vadd.f32 %v648_v7, %v647_v3  ;;  %v650_v9 = vpop.f32.mrb[6].mxu1 }
 0x102   :  { %v651_v11 = vpop.f32.mrb[7].mxu1 }
 0x103   :  { %v427_v10 = vadd.f32 %v624_v6, %v548_v47  ;;  %v652_v12 = vadd.f32 %v651_v11, %v650_v9  ;;  %v473_v13 = vadd.f32 %v649_v8, %v424_v5 }
 0x105   :  { %v669_v14 = vpop.f32.mrb[8].mxu0  ;;  %v476_v15 = vadd.f32 %v652_v12, %v427_v10 }
 0x106   :  { %v522_v16 = vadd.f32 %v669_v14, %v473_v13  ;;  %v513_v17 = vpop.f32.mrb[9].mxu0 }
 0x107   :  { %v514_v18 = vadd.f32 %v513_v17, %v465_v61  ;;  %v670_v19 = vpop.f32.mrb[10].mxu0 }
 0x108   :  { %530 = vst [vmem:[%s914_s4 + $0x10] sm:$0xff] %v522_v16  ;;  %v534_v20 = vmax.f32 %v522_v16, 0.0  ;;  %v525_v21 = vadd.f32 %v670_v19, %v476_v15  ;;  %v516_v22 = vpop.f32.mrb[11].mxu0 }
 0x109   :  { %528 = vst [vmem:[%s914_s4] sm:$0xff] %v514_v18  ;;  %v532_v23 = vmax.f32 %v514_v18, 0.0  ;;  %v517_v24 = vadd.f32 %v516_v22, %v468_v0 }
 0x10a   :  { %538 = vst [vmem:[%s915_s3 + $0x10] sm:$0xff] %v534_v20  ;;  %531 = vst [vmem:[%s914_s4 + $0x18] sm:$0xff] %v525_v21  ;;  %v535_v25 = vmax.f32 %v525_v21, 0.0 }
 0x10b   :  { %536 = vst [vmem:[%s915_s3] sm:$0xff] %v532_v23  ;;  %529 = vst [vmem:[%s914_s4 + $0x8] sm:$0xff] %v517_v24  ;;  %v533_v26 = vmax.f32 %v517_v24, 0.0 }
 0x10c   :  { %539 = vst [vmem:[%s915_s3 + $0x18] sm:$0xff] %v535_v25 }
 0x10d   :  { %537 = vst [vmem:[%s915_s3 + $0x8] sm:$0xff] %v533_v26 }

</bundles_post_ra>
